<compile_context>
chip_gen: v6e
topology: v6e:2x2x1
jax: 0.10.0
libtpu: 0.0.40
codegen_flags: <defaults>
</compile_context>

<pallas_src>
import functools

import jax
import jax.numpy as jnp
from jax.experimental import pallas as pl
from jax.experimental.pallas import tpu as pltpu


_LANES = 128           # points per sublane-row
_ROW = 3 * _LANES      # interleaved f32 values per row: [x0 y0 z0 x1 y1 z1 ...]
_CHUNK = 512           # sublane-rows per in-kernel compute chunk


def _round_up(x, m):
    return ((x + m - 1) // m) * m


def _make_kernel(tile_r, chunk, out_dtype):
    """Builds the kernel for one grid step of `tile_r` rows, computed `chunk` rows at a time."""
    n_full = tile_r // chunk
    rem = tile_r - n_full * chunk

    def compute(v, cb, sel, rad):
        # v: (rows, 384) f32 xyz-interleaved; cb: (1, 384) tiled center.
        diff = v - cb
        sq = diff * diff
        # Stride-3 grouped lane sum on the (idle) MXU via a 0/1 selection
        # matrix, in two bf16 passes with hi/lo splitting: exact bf16 products
        # with f32 accumulation keep ~f32 accuracy at 2 MXU passes instead of
        # a 6-pass f32 matmul (which would bind the MXU on v5e/v7x).
        sq_hi = sq.astype(jnp.bfloat16)
        sq_lo = (sq - sq_hi.astype(jnp.float32)).astype(jnp.bfloat16)
        d2 = (jnp.dot(sq_hi, sel, preferred_element_type=jnp.float32)
              + jnp.dot(sq_lo, sel, preferred_element_type=jnp.float32))
        # TODO(synk): if a custom VJP is ever added, guard sqrt with max(d2, eps).
        return (jnp.sqrt(d2) - rad).astype(out_dtype)

    def kernel(rad_ref, cb_ref, sel_ref, pts_ref, out_ref):
        cb = cb_ref[...]
        sel = sel_ref[...]
        rad = rad_ref[0]

        if n_full == 1 and rem == 0:
            # Single-chunk tile (small problems): no inner loop.
            out_ref[...] = compute(pts_ref[...], cb, sel, rad)
            return

        if n_full > 0:
            def body(c, carry):
                r0 = pl.multiple_of(c * chunk, chunk)
                out_ref[pl.ds(r0, chunk), :] = compute(
                    pts_ref[pl.ds(r0, chunk), :], cb, sel, rad)
                return carry
            jax.lax.fori_loop(0, n_full, body, 0)

        if rem > 0:
            r0 = n_full * chunk            # static, chunk-aligned offset
            out_ref[r0:r0 + rem, :] = compute(pts_ref[r0:r0 + rem, :], cb, sel, rad)

    return kernel


@functools.partial(jax.jit, static_argnames=("out_dtype",))
def sphere_sdf(points, center, radius, *, out_dtype=jnp.float32):
    """||points.view(-1, 3) - center||_2 - radius, returned as (N, 1)."""
    pts = jnp.asarray(points, jnp.float32).reshape(-1, 3)
    n = pts.shape[0]

    n_pad = _round_up(max(n, 1), _LANES)
    if n_pad != n:
        # TODO(synk): fold tail padding of non-128-aligned point counts into the
        # kernel (masked last lane-row) to avoid this extra HBM copy.
        pts = jnp.pad(pts, ((0, n_pad - n), (0, 0)))
    r_rows = n_pad // _LANES
    # Free (bitcast) reshape: point-major, xyz interleaved along lanes.
    pts_rows = pts.reshape(r_rows, _ROW)

    center3 = jnp.asarray(center, jnp.float32).reshape(3)
    cb = jnp.tile(center3, _LANES).reshape(1, _ROW)                    # [cx cy cz cx ...]
    sel = jnp.repeat(jnp.eye(_LANES, dtype=jnp.bfloat16), 3, axis=0)   # (384, 128) 0/1
    rad = jnp.asarray(radius, jnp.float32).reshape(1)

    # ---- hardware-aware tile / VMEM budget ---------------------------------
    out_itemsize = jnp.dtype(out_dtype).itemsize
    row_io = _ROW * 4 + _LANES * out_itemsize            # bytes/row (input + output)
    vmem_cap = 64 << 20                                  # safe default (v7x-sized)
    num_tc = 1
    try:
        info = pltpu.get_tpu_info()
        vmem_cap = int(getattr(info, "vmem_capacity_bytes", 0) or vmem_cap)
        num_tc = int(getattr(info, "num_cores", None)
                     or getattr(info, "tensor_core_count", None)
                     or getattr(info, "cores_per_chip", None) or 1)
    except Exception:
        pass
    # Headroom for per-chunk f32 intermediates (~4 MiB), the selection matrix
    # and compiler scratch; the remainder goes to the double-buffered IO blocks.
    io_budget = max(8 << 20, int(vmem_cap * 0.7) - (6 << 20))
    max_tile_r = max(_CHUNK, (io_budget // (2 * row_io)) // _CHUNK * _CHUNK)

    steps = pl.cdiv(r_rows, max_tile_r)
    if num_tc >= 2 and steps == 1 and r_rows >= 1024:
        steps = 2                       # use both TensorCores when each half is still >~0.75 MiB
    if steps > 1 and steps % 2:
        steps += 1                      # even split across 2 TCs (v7x); ~free on 1-TC chips

    if steps == 1:
        tile_r = r_rows                 # single step: no pointless extra grid-step overhead
    else:
        tile_r = min(max_tile_r, _round_up(pl.cdiv(r_rows, steps), _CHUNK))
    chunk = min(_CHUNK, tile_r)
    grid = (pl.cdiv(r_rows, tile_r),)

    vmem_limit = 2 * tile_r * row_io + (12 << 20)
    vmem_limit = int(max(16 << 20, min(vmem_limit, vmem_cap - (2 << 20))))

    out = pl.pallas_call(
        _make_kernel(tile_r, chunk, out_dtype),
        out_shape=jax.ShapeDtypeStruct((r_rows, _LANES), out_dtype),
        grid=grid,
        in_specs=[
            pl.BlockSpec(memory_space=pltpu.SMEM),                    # radius (1,)
            pl.BlockSpec((1, _ROW), lambda i: (0, 0)),                # tiled center row
            pl.BlockSpec((_ROW, _LANES), lambda i: (0, 0)),           # stride-3 selection matrix
            pl.BlockSpec((tile_r, _ROW), lambda i: (i, 0)),           # interleaved points
        ],
        out_specs=pl.BlockSpec((tile_r, _LANES), lambda i: (i, 0)),
        compiler_params=pltpu.CompilerParams(
            dimension_semantics=("parallel",),
            vmem_limit_bytes=vmem_limit,
        ),
    )(rad, cb, sel, pts_rows)

    # (R, 128) -> (n_pad, 1) is a free row-major reshape; drop padded tail rows.
    out = out.reshape(n_pad, 1)
    return out if n_pad == n else out[:n]


if __name__ == "__main__":
    key = jax.random.PRNGKey(0)

    # Deterministic "parameters" (cfg.radius.val, cfg.center.val analogues).
    radius = jnp.float32(1.0)
    center = jnp.array([[0.1, -0.2, 0.3]], dtype=jnp.float32)   # (1, 3)

    # Example input: (2, 64, 3) points -> flattened to (128, 3) in forward.
    points = jax.random.normal(key, (2, 64, 3), dtype=jnp.float32)

    sdf = sphere_sdf(points, center, radius)
    sdf = jax.block_until_ready(sdf)

    # Reference check in plain JAX (same math as the PyTorch module).
    ref = jnp.linalg.norm(points.reshape(-1, 3) - center, axis=-1,
                          keepdims=True) - radius
    assert sdf.shape == (128, 1), sdf.shape
    assert jnp.allclose(sdf, ref, atol=1e-5, rtol=1e-5), \
        float(jnp.max(jnp.abs(sdf - ref)))

    print("KERNEL_OK")
</pallas_src>

<mosaic_0001>
module attributes {stable_mosaic.version = 11 : i64} {
  func.func @kernel(%arg0: i32, %arg1: memref<1xf32, #tpu.memory_space<smem>>, %arg2: memref<1x384xf32, #tpu.memory_space<vmem>>, %arg3: memref<384x128xbf16, #tpu.memory_space<vmem>>, %arg4: memref<1x384xf32, #tpu.memory_space<vmem>>, %arg5: memref<1x128xf32, #tpu.memory_space<vmem>>) attributes {dimension_semantics = [#tpu.dimension_semantics<parallel>], iteration_bounds = array<i64: 1>, scalar_prefetch = 0 : i64, scratch_operands = 0 : i64, tpu.core_type = #tpu.core_type<tc>, window_params = [{transform_indices = @transform_0, window_bounds = array<i64: 1>}, {pipeline_mode = #tpu.pipeline_mode<synchronous>, transform_indices = @transform_1, window_bounds = array<i64: 1, 384>}, {pipeline_mode = #tpu.pipeline_mode<synchronous>, transform_indices = @transform_2, window_bounds = array<i64: 384, 128>}, {transform_indices = @transform_3, window_bounds = array<i64: 1, 384>}, {transform_indices = @transform_4, window_bounds = array<i64: 1, 128>}]} {
    %c0 = arith.constant 0 : index
    %c0_0 = arith.constant 0 : index
    %0 = vector.load %arg2[%c0, %c0_0] : memref<1x384xf32, #tpu.memory_space<vmem>>, vector<1x384xf32>
    %c0_1 = arith.constant 0 : index
    %c0_2 = arith.constant 0 : index
    %1 = vector.load %arg3[%c0_1, %c0_2] : memref<384x128xbf16, #tpu.memory_space<vmem>>, vector<384x128xbf16>
    %c0_3 = arith.constant 0 : index
    %2 = memref.load %arg1[%c0_3] : memref<1xf32, #tpu.memory_space<smem>>
    %c0_4 = arith.constant 0 : index
    %c0_5 = arith.constant 0 : index
    %3 = vector.load %arg4[%c0_4, %c0_5] : memref<1x384xf32, #tpu.memory_space<vmem>>, vector<1x384xf32>
    %4 = arith.subf %3, %0 : vector<1x384xf32>
    %5 = arith.mulf %4, %4 : vector<1x384xf32>
    %6 = arith.truncf %5 : vector<1x384xf32> to vector<1x384xbf16>
    %7 = arith.extf %6 : vector<1x384xbf16> to vector<1x384xf32>
    %8 = arith.subf %5, %7 : vector<1x384xf32>
    %9 = arith.truncf %8 : vector<1x384xf32> to vector<1x384xbf16>
    %cst = arith.constant dense<0.000000e+00> : vector<1x128xf32>
    %10 = tpu.matmul %6, %1, %cst {dimension_numbers = #tpu.dot_dimension_numbers<[1], [0], [0], [1], [0, 0, 1, 1], [], []>} : vector<1x384xbf16>, vector<384x128xbf16>, vector<1x128xf32> -> vector<1x128xf32>
    %cst_6 = arith.constant dense<0.000000e+00> : vector<1x128xf32>
    %11 = tpu.matmul %9, %1, %cst_6 {dimension_numbers = #tpu.dot_dimension_numbers<[1], [0], [0], [1], [0, 0, 1, 1], [], []>} : vector<1x384xbf16>, vector<384x128xbf16>, vector<1x128xf32> -> vector<1x128xf32>
    %12 = arith.addf %10, %11 : vector<1x128xf32>
    %13 = math.sqrt %12 : vector<1x128xf32>
    %14 = vector.broadcast %2 : f32 to vector<1x128xf32>
    %15 = arith.subf %13, %14 : vector<1x128xf32>
    %c0_7 = arith.constant 0 : index
    %c0_8 = arith.constant 0 : index
    %16 = vector.load %arg5[%c0_7, %c0_8] : memref<1x128xf32, #tpu.memory_space<vmem>>, vector<1x128xf32>
    tpu.vector_store %arg5[%c0_7, %c0_8], %15 {strides = array<i32>} : memref<1x128xf32, #tpu.memory_space<vmem>>, vector<1x128xf32>,
    return
  }
  func.func @transform_0(%arg0: i32) -> i32 {
    %c0_i32 = arith.constant 0 : i32
    %c0_i32_0 = arith.constant 0 : i32
    return %c0_i32 : i32
  }
  func.func @transform_1(%arg0: i32) -> (i32, i32) {
    %c0_i32 = arith.constant 0 : i32
    %c0_i32_0 = arith.constant 0 : i32
    %c0_i32_1 = arith.constant 0 : i32
    return %c0_i32, %c0_i32_0 : i32, i32
  }
  func.func @transform_2(%arg0: i32) -> (i32, i32) {
    %c0_i32 = arith.constant 0 : i32
    %c0_i32_0 = arith.constant 0 : i32
    %c0_i32_1 = arith.constant 0 : i32
    return %c0_i32, %c0_i32_0 : i32, i32
  }
  func.func @transform_3(%arg0: i32) -> (i32, i32) {
    %c0_i32 = arith.constant 0 : i32
    %c0_i32_0 = arith.constant 0 : i32
    return %arg0, %c0_i32 : i32, i32
  }
  func.func @transform_4(%arg0: i32) -> (i32, i32) {
    %c0_i32 = arith.constant 0 : i32
    %c0_i32_0 = arith.constant 0 : i32
    return %arg0, %c0_i32 : i32, i32
  }
}

</mosaic_0001>

<bundles_post_ra>
// kernel: tile.6
= control target key start
LH: loop header
LB: loop body
LE: loop exit
PB: predicated region body
PF: predicated region fallthrough
CT: control target
= control target key end

     0   :  { %s112_s0 = inlined_call_operand.vmem [shape: f32[3], index: 0, kind: input, shape index: {}]   ;;  %s113_s1 = inlined_call_operand.vmem [shape: f32[128,3], index: 1, kind: output, shape index: {}]  }
   0x1   :  { %v4_v0 = vld [vmem:[%s112_s0] ss:$0 sm:$0xff] }
   0x2   :  { %5 = vst [vmem:[%s113_s1] sm:$0xff] %v4_v0  ;;  %36 = vst [vmem:[%s113_s1 + $0x8] sm:$0xff] %v4_v0 }
   0x3   :  { %37 = vst [vmem:[%s113_s1 + $0x10] sm:$0xff] %v4_v0  ;;  %38 = vst [vmem:[%s113_s1 + $0x18] sm:$0xff] %v4_v0 }
   0x4   :  { %39 = vst [vmem:[%s113_s1 + $0x20] sm:$0xff] %v4_v0  ;;  %40 = vst [vmem:[%s113_s1 + $0x28] sm:$0xff] %v4_v0 }
   0x5   :  { %41 = vst [vmem:[%s113_s1 + $0x30] sm:$0xff] %v4_v0  ;;  %42 = vst [vmem:[%s113_s1 + $0x38] sm:$0xff] %v4_v0 }
   0x6   :  { %43 = vst [vmem:[%s113_s1 + $0x40] sm:$0xff] %v4_v0  ;;  %44 = vst [vmem:[%s113_s1 + $0x48] sm:$0xff] %v4_v0 }
   0x7   :  { %45 = vst [vmem:[%s113_s1 + $0x50] sm:$0xff] %v4_v0  ;;  %46 = vst [vmem:[%s113_s1 + $0x58] sm:$0xff] %v4_v0 }
   0x8   :  { %47 = vst [vmem:[%s113_s1 + $0x60] sm:$0xff] %v4_v0  ;;  %48 = vst [vmem:[%s113_s1 + $0x68] sm:$0xff] %v4_v0 }
   0x9   :  { %49 = vst [vmem:[%s113_s1 + $0x70] sm:$0xff] %v4_v0  ;;  %50 = vst [vmem:[%s113_s1 + $0x78] sm:$0xff] %v4_v0 }

// kernel: tile.7
= control target key start
LH: loop header
LB: loop body
LE: loop exit
PB: predicated region body
PF: predicated region fallthrough
CT: control target
= control target key end

     0   :  { %vm9_vm0 = vcmask 7168   ;;  %vm13_vm1 = vcmask 15360   ;;  %s1146_s14 = smov 127   ;;  %s1147_s15 = smov 125   ;;  %vm3_vm2 = vcmask 23552   ;;  %vm16_vm3 = vcmask 1048568   ;;  %s1686_s0 = inlined_call_operand.vmem [shape: f32[128,3], index: 0, kind: input, shape index: {}]   ;;  %s1687_s1 = inlined_call_operand.vmem [shape: f32[1,384], index: 1, kind: output, shape index: {}]  }
   0x1   :  { %v888_v0 = vld [vmem:[%s1686_s0 + $0x55] sm:$0x1]   ;;  %v892_v3 = vld [vmem:[%s1686_s0 + $0x7f] sm:$0x1]   ;;  %v890_v4 = vld [vmem:[%s1686_s0 + $0x2a] sm:$0x1]  }
   0x2   :  { %v889_v1 = vld [vmem:[%s1686_s0 + $0x55] sm:$0x1]   ;;  %34 = vrot.lane.b32.xlu1 %v892_v3, %s1147_s15  ;;  %v891_v5 = vld [vmem:[%s1686_s0 + $0x2a] sm:$0x1]   ;;  %v893_v7 = vld [vmem:[%s1686_s0 + $0x54] sm:$0x1]  }
   0x3   :  { %v10_v2 = vsel %vm9_vm0, %v889_v1, %v888_v0  ;;  %v24_v6 = vsel %vm13_vm1, %v891_v5, %v890_v4  ;;  %s1148_s20 = smov 126   ;;  %s1149_s21 = smov 124   ;;  %v894_v8 = vld [vmem:[%s1686_s0 + $0x29] sm:$0x1]   ;;  %v895_v9 = vld [vmem:[%s1686_s0 + $0x7e] sm:$0x1]  }
   0x4   :  { %11 = vrot.lane.b32.xlu0 %v10_v2, %s1146_s14  ;;  %s1150_s26 = smov 123   ;;  %s1151_s27 = smov 122   ;;  %v896_v10 = vld [vmem:[%s1686_s0 + $0x53] sm:$0x1]   ;;  %v897_v11 = vld [vmem:[%s1686_s0 + $0x28] sm:$0x1]  }
   0x5   :  { %s1152_s3 = smov 121   ;;  %s1153_s4 = smov 120   ;;  %v898_v12 = vld [vmem:[%s1686_s0 + $0x7d] sm:$0x1]   ;;  %v899_v13 = vld [vmem:[%s1686_s0 + $0x52] sm:$0x1]  }
   0x6   :  { %41 = vrot.lane.b32.xlu1 %v893_v7, %s1149_s21  ;;  %s1154_s9 = smov 119   ;;  %s1155_s10 = smov 118   ;;  %v900_v14 = vld [vmem:[%s1686_s0 + $0x27] sm:$0x1]   ;;  %v901_v15 = vld [vmem:[%s1686_s0 + $0x7c] sm:$0x1]  }
   0x7   :  { %s1156_s15 = smov 117   ;;  %s1157_s16 = smov 116   ;;  %v902_v16 = vld [vmem:[%s1686_s0 + $0x51] sm:$0x1]   ;;  %v903_v17 = vld [vmem:[%s1686_s0 + $0x26] sm:$0x1]  }
   0x8   :  { %25 = vrot.lane.b32.xlu0 %v24_v6, %s1148_s20  ;;  %s1158_s21 = smov 115   ;;  %s1159_s22 = smov 114   ;;  %v904_v18 = vld [vmem:[%s1686_s0 + $0x7b] sm:$0x1]   ;;  %v905_v19 = vld [vmem:[%s1686_s0 + $0x50] sm:$0x1]  }
   0x9   :  { %s1161_s28 = smov 112   ;;  %v906_v20 = vld [vmem:[%s1686_s0 + $0x25] sm:$0x1]   ;;  %v907_v21 = vld [vmem:[%s1686_s0 + $0x7a] sm:$0x1]   ;;  %s1162_s6 = smov 111  }
   0xa   :  { %54 = vrot.lane.b32.xlu1 %v895_v9, %s1151_s27  ;;  %s1160_s27 = smov 113   ;;  %v2_v22 = vld [vmem:[%s1686_s0] sm:$0x1]   ;;  %s1163_s7 = smov 110   ;;  %v908_v23 = vld [vmem:[%s1686_s0 + $0x4f] sm:$0x1]  }
   0xb   :  { %4 = vst.msk [vmem:[#allocation0] sm:$0x1] %vm3_vm2, %v2_v22   ;;  %v909_v24 = vld [vmem:[%s1686_s0 + $0x24] sm:$0x1]   ;;  %s1164_s12 = smov 109   ;;  %s1165_s13 = smov 108  }
   0xc   :  { %48 = vrot.lane.b32.xlu0 %v894_v8, %s1150_s26  ;;  %v910_v25 = vld [vmem:[%s1686_s0 + $0x79] sm:$0x1]   ;;  %v911_v26 = vld [vmem:[%s1686_s0 + $0x4e] sm:$0x1]   ;;  %s1166_s18 = smov 107   ;;  %s1167_s19 = smov 106  }
   0xd   :  { %v912_v27 = vld [vmem:[%s1686_s0 + $0x23] sm:$0x1]   ;;  %v913_v28 = vld [vmem:[%s1686_s0 + $0x78] sm:$0x1]   ;;  %s1168_s24 = smov 105   ;;  %s1169_s25 = smov 104  }
   0xe   :  { %68 = vrot.lane.b32.xlu1 %v897_v11, %s1153_s4  ;;  %v914_v29 = vld [vmem:[%s1686_s0 + $0x4d] sm:$0x1]   ;;  %v915_v30 = vld [vmem:[%s1686_s0 + $0x22] sm:$0x1]   ;;  %s1170_s30 = smov 103   ;;  %s1171_s2 = smov 102  }
   0xf   :  { %v916_v31 = vld [vmem:[%s1686_s0 + $0x77] sm:$0x1]   ;;  %v917_v32 = vld [vmem:[%s1686_s0 + $0x4c] sm:$0x1]   ;;  %s1173_s8 = smov 100   ;;  %s1175_s14 = smov 98  }
  0x10   :  { %61 = vrot.lane.b32.xlu0 %v896_v10, %s1152_s3  ;;  %v918_v33 = vld [vmem:[%s1686_s0 + $0x21] sm:$0x1]   ;;  %v919_v34 = vld [vmem:[%s1686_s0 + $0x76] sm:$0x1]   ;;  %v920_v35 = vld [vmem:[%s1686_s0 + $0x4b] sm:$0x1]  }
  0x11   :  { %v921_v36 = vld [vmem:[%s1686_s0 + $0x20] sm:$0x1]   ;;  %s1177_s20 = smov 96   ;;  %v922_v37 = vld [vmem:[%s1686_s0 + $0x75] sm:$0x1]   ;;  %s1179_s26 = smov 94  }
  0x12   :  { %81 = vrot.lane.b32.xlu1 %v899_v13, %s1155_s10  ;;  %v923_v38 = vld [vmem:[%s1686_s0 + $0x4a] sm:$0x1]   ;;  %v924_v39 = vld [vmem:[%s1686_s0 + $0x1f] sm:$0x1]   ;;  %v925_v40 = vld [vmem:[%s1686_s0 + $0x74] sm:$0x1]  }
  0x13   :  { %s1181_s3 = smov 92   ;;  %v926_v41 = vld [vmem:[%s1686_s0 + $0x49] sm:$0x1]   ;;  %v927_v42 = vld [vmem:[%s1686_s0 + $0x1e] sm:$0x1]   ;;  %s1191_s4 = smov 82  }
  0x14   :  { %74 = vrot.lane.b32.xlu0 %v898_v12, %s1154_s9  ;;  %s1183_s9 = smov 90   ;;  %v928_v43 = vld [vmem:[%s1686_s0 + $0x73] sm:$0x1]   ;;  %v929_v44 = vld [vmem:[%s1686_s0 + $0x48] sm:$0x1]   ;;  %s1193_s10 = smov 80  }
  0x15   :  { %v930_v45 = vld [vmem:[%s1686_s0 + $0x1d] sm:$0x1]   ;;  %v931_v46 = vld [vmem:[%s1686_s0 + $0x72] sm:$0x1]   ;;  %v932_v47 = vld [vmem:[%s1686_s0 + $0x47] sm:$0x1]  }
  0x16   :  { %94 = vrot.lane.b32.xlu1 %v901_v15, %s1157_s16  ;;  %v933_v48 = vld [vmem:[%s1686_s0 + $0x1c] sm:$0x1]   ;;  %v934_v49 = vld [vmem:[%s1686_s0 + $0x71] sm:$0x1]   ;;  %v935_v50 = vld [vmem:[%s1686_s0 + $0x46] sm:$0x1]  }
  0x17   :  { %v936_v51 = vld [vmem:[%s1686_s0 + $0x1b] sm:$0x1]   ;;  %v937_v52 = vld [vmem:[%s1686_s0 + $0x70] sm:$0x1]   ;;  %v938_v53 = vld [vmem:[%s1686_s0 + $0x45] sm:$0x1]  }
  0x18   :  { %88 = vrot.lane.b32.xlu0 %v900_v14, %s1156_s15  ;;  %s1185_s15 = smov 88   ;;  %v939_v54 = vld [vmem:[%s1686_s0 + $0x1a] sm:$0x1]   ;;  %s1195_s16 = smov 78   ;;  %v940_v55 = vld [vmem:[%s1686_s0 + $0x6f] sm:$0x1]  }
  0x19   :  { %v941_v56 = vld [vmem:[%s1686_s0 + $0x44] sm:$0x1]   ;;  %v942_v57 = vld [vmem:[%s1686_s0 + $0x19] sm:$0x1]   ;;  %v943_v58 = vld [vmem:[%s1686_s0 + $0x6e] sm:$0x1]  }
  0x1a   :  { %108 = vrot.lane.b32.xlu1 %v903_v17, %s1159_s22  ;;  %s1197_s22 = smov 76   ;;  %v944_v59 = vld [vmem:[%s1686_s0 + $0x43] sm:$0x1]   ;;  %v945_v60 = vld [vmem:[%s1686_s0 + $0x18] sm:$0x1]   ;;  %s1201_s5 = smov 72  }
  0x1b   :  { %v946_v61 = vld [vmem:[%s1686_s0 + $0x6d] sm:$0x1]   ;;  %v947_v62 = vld [vmem:[%s1686_s0 + $0x42] sm:$0x1]   ;;  %s1203_s11 = smov 70   ;;  %vm36_vm4 = vcmask 1048552  }
  0x1c   :  { %101 = vrot.lane.b32.xlu0 %v902_v16, %s1158_s21  ;;  %s1187_s21 = smov 86   ;;  %v948_v63 = vld [vmem:[%s1686_s0 + $0x17] sm:$0x1]   ;;  %v949_v0 = vld [vmem:[%s1686_s0 + $0x6c] sm:$0x1]   ;;  %vm30_vm5 = vcmask 1048560  }
  0x1d   :  { %s1205_s17 = smov 68   ;;  %v950_v3 = vld [vmem:[%s1686_s0 + $0x41] sm:$0x1]   ;;  %vm43_vm6 = vcmask 1040352   ;;  %v951_v4 = vld [vmem:[%s1686_s0 + $0x16] sm:$0x1]  }
  0x1e   :  { %121 = vrot.lane.b32.xlu1 %v905_v19, %s1161_s28  ;;  %s1199_s28 = smov 74   ;;  %vm50_vm7 = vcmask 1032152   ;;  %s1207_s23 = smov 66   ;;  %vm56_vm8 = vcmask 1023952   ;;  %v952_v7 = vld [vmem:[%s1686_s0 + $0x6b] sm:$0x1]  }
  0x1f   :  { %v953_v8 = vld [vmem:[%s1686_s0 + $0x40] sm:$0x1]   ;;  %vm63_vm9 = vcmask 1015752   ;;  %s1209_s29 = smov 64   ;;  %vm70_vm10 = vcmask 1007552   ;;  %vm76_vm11 = vcmask 999352  }
  0x20   :  { %114 = vrot.lane.b32.xlu0 %v904_v18, %s1160_s27  ;;  %s1189_s27 = smov 84   ;;  %v954_v11 = vld [vmem:[%s1686_s0 + $0x15] sm:$0x1]   ;;  %v955_v12 = vld [vmem:[%s1686_s0 + $0x6a] sm:$0x1]   ;;  %vm83_vm12 = vcmask 991152  }
  0x21   :  { %v956_v15 = vld [vmem:[%s1686_s0 + $0x3f] sm:$0x1]   ;;  %v957_v16 = vld [vmem:[%s1686_s0 + $0x14] sm:$0x1]   ;;  %vm90_vm13 = vcmask 982952   ;;  %vm96_vm14 = vcmask 974752  }
  0x22   :  { %134 = vrot.lane.b32.xlu1 %v907_v21, %s1163_s7  ;;  %s1172_s7 = smov 101   ;;  %v958_v19 = vld [vmem:[%s1686_s0 + $0x69] sm:$0x1]   ;;  %vm103_vm15 = vcmask 966552   ;;  %vm123_vm2 = vcmask 941952  }
  0x24   :  { %128 = vrot.lane.b32.xlu0 %v906_v20, %s1162_s6  ;;  %s1211_s6 = smov 62   ;;  %v959_v20 = vld [vmem:[%s1686_s0 + $0x3e] sm:$0x1]  }
  0x26   :  { %148 = vrot.lane.b32.xlu1 %v909_v24, %s1165_s13  ;;  %s1174_s13 = smov 99   ;;  %v961_v24 = vld [vmem:[%s1686_s0 + $0x68] sm:$0x1]  }
  0x28   :  { %141 = vrot.lane.b32.xlu0 %v908_v23, %s1164_s12  ;;  %s1213_s12 = smov 60   ;;  %v960_v23 = vld [vmem:[%s1686_s0 + $0x13] sm:$0x1]  }
  0x2a   :  { %161 = vrot.lane.b32.xlu1 %v911_v26, %s1167_s19  ;;  %s1176_s19 = smov 97  }
  0x2c   :  { %154 = vrot.lane.b32.xlu0 %v910_v25, %s1166_s18  ;;  %s1215_s18 = smov 58  }
  0x2e   :  { %174 = vrot.lane.b32.xlu1 %v913_v28, %s1169_s25  ;;  %s1178_s25 = smov 95   ;;  %v963_v28 = vld [vmem:[%s1686_s0 + $0x12] sm:$0x1]  }
  0x30   :  { %168 = vrot.lane.b32.xlu0 %v912_v27, %s1168_s24  ;;  %s1217_s24 = smov 56   ;;  %v962_v27 = vld [vmem:[%s1686_s0 + $0x3d] sm:$0x1]  }
  0x32   :  { %188 = vrot.lane.b32.xlu1 %v915_v30, %s1171_s2  ;;  %s1180_s2 = smov 93  }
  0x34   :  { %181 = vrot.lane.b32.xlu0 %v914_v29, %s1170_s30  ;;  %s1219_s30 = smov 54  }
  0x36   :  { %201 = vrot.lane.b32.xlu1 %v917_v32, %s1173_s8  ;;  %s1182_s8 = smov 91   ;;  %v965_v32 = vld [vmem:[%s1686_s0 + $0x3c] sm:$0x1]  }
  0x38   :  { %194 = vrot.lane.b32.xlu0 %v916_v31, %s1172_s7  ;;  %v964_v31 = vld [vmem:[%s1686_s0 + $0x67] sm:$0x1]   ;;  %s1221_s7 = smov 52  }
  0x3a   :  { %214 = vrot.lane.b32.xlu1 %v919_v34, %s1175_s14  ;;  %s1184_s14 = smov 89  }
  0x3c   :  { %208 = vrot.lane.b32.xlu0 %v918_v33, %s1174_s13  ;;  %s1223_s13 = smov 50  }
  0x3e   :  { %228 = vrot.lane.b32.xlu1 %v921_v36, %s1177_s20  ;;  %s1186_s20 = smov 87   ;;  %v967_v36 = vld [vmem:[%s1686_s0 + $0x66] sm:$0x1]  }
  0x40   :  { %221 = vrot.lane.b32.xlu0 %v920_v35, %s1176_s19  ;;  %v966_v35 = vld [vmem:[%s1686_s0 + $0x11] sm:$0x1]   ;;  %s1225_s19 = smov 48  }
  0x42   :  { %241 = vrot.lane.b32.xlu1 %v923_v38, %s1179_s26  ;;  %s1188_s26 = smov 85  }
  0x44   :  { %234 = vrot.lane.b32.xlu0 %v922_v37, %s1178_s25  ;;  %s1227_s25 = smov 46  }
  0x46   :  { %254 = vrot.lane.b32.xlu1 %v925_v40, %s1181_s3  ;;  %s1190_s3 = smov 83   ;;  %v969_v40 = vld [vmem:[%s1686_s0 + $0x10] sm:$0x1]  }
  0x48   :  { %248 = vrot.lane.b32.xlu0 %v924_v39, %s1180_s2  ;;  %v968_v39 = vld [vmem:[%s1686_s0 + $0x3b] sm:$0x1]   ;;  %s1229_s2 = smov 44  }
  0x4a   :  { %268 = vrot.lane.b32.xlu1 %v927_v42, %s1183_s9  ;;  %s1192_s9 = smov 81  }
  0x4c   :  { %261 = vrot.lane.b32.xlu0 %v926_v41, %s1182_s8  ;;  %s1231_s8 = smov 42  }
  0x4e   :  { %281 = vrot.lane.b32.xlu1 %v929_v44, %s1185_s15  ;;  %s1194_s15 = smov 79   ;;  %v971_v44 = vld [vmem:[%s1686_s0 + $0x3a] sm:$0x1]  }
  0x50   :  { %274 = vrot.lane.b32.xlu0 %v928_v43, %s1184_s14  ;;  %v970_v43 = vld [vmem:[%s1686_s0 + $0x65] sm:$0x1]   ;;  %s1233_s14 = smov 40  }
  0x52   :  { %294 = vrot.lane.b32.xlu1 %v931_v46, %s1187_s21  ;;  %s1196_s21 = smov 77  }
  0x54   :  { %288 = vrot.lane.b32.xlu0 %v930_v45, %s1186_s20  ;;  %s1235_s20 = smov 38  }
  0x56   :  { %308 = vrot.lane.b32.xlu1 %v933_v48, %s1189_s27  ;;  %s1198_s27 = smov 75   ;;  %v973_v48 = vld [vmem:[%s1686_s0 + $0x64] sm:$0x1]  }
  0x58   :  { %301 = vrot.lane.b32.xlu0 %v932_v47, %s1188_s26  ;;  %v972_v47 = vld [vmem:[%s1686_s0 + $0xf] sm:$0x1]   ;;  %s1237_s26 = smov 36  }
  0x5a   :  { %321 = vrot.lane.b32.xlu1 %v935_v50, %s1191_s4  ;;  %s1200_s4 = smov 73  }
  0x5c   :  { %314 = vrot.lane.b32.xlu0 %v934_v49, %s1190_s3  ;;  %s1239_s3 = smov 34  }
  0x5e   :  { %334 = vrot.lane.b32.xlu1 %v937_v52, %s1193_s10  ;;  %s1202_s10 = smov 71   ;;  %v975_v52 = vld [vmem:[%s1686_s0 + $0xe] sm:$0x1]  }
  0x60   :  { %328 = vrot.lane.b32.xlu0 %v936_v51, %s1192_s9  ;;  %v974_v51 = vld [vmem:[%s1686_s0 + $0x39] sm:$0x1]   ;;  %s1241_s9 = smov 32  }
  0x62   :  { %348 = vrot.lane.b32.xlu1 %v939_v54, %s1195_s16  ;;  %s1204_s16 = smov 69  }
  0x64   :  { %341 = vrot.lane.b32.xlu0 %v938_v53, %s1194_s15  ;;  %s1243_s15 = smov 30  }
  0x66   :  { %361 = vrot.lane.b32.xlu1 %v941_v56, %s1197_s22  ;;  %s1206_s22 = smov 67   ;;  %v977_v56 = vld [vmem:[%s1686_s0 + $0x38] sm:$0x1]  }
  0x68   :  { %354 = vrot.lane.b32.xlu0 %v940_v55, %s1196_s21  ;;  %v976_v55 = vld [vmem:[%s1686_s0 + $0x63] sm:$0x1]   ;;  %s1245_s21 = smov 28  }
  0x6a   :  { %374 = vrot.lane.b32.xlu1 %v943_v58, %s1199_s28  ;;  %s1208_s28 = smov 65  }
  0x6c   :  { %368 = vrot.lane.b32.xlu0 %v942_v57, %s1198_s27  ;;  %s1247_s27 = smov 26  }
  0x6e   :  { %388 = vrot.lane.b32.xlu1 %v945_v60, %s1201_s5  ;;  %s1210_s5 = smov 63   ;;  %v979_v60 = vld [vmem:[%s1686_s0 + $0x62] sm:$0x1]  }
  0x70   :  { %381 = vrot.lane.b32.xlu0 %v944_v59, %s1200_s4  ;;  %v978_v59 = vld [vmem:[%s1686_s0 + $0xd] sm:$0x1]   ;;  %s1249_s4 = smov 24  }
  0x72   :  { %401 = vrot.lane.b32.xlu1 %v947_v62, %s1203_s11  ;;  %s1212_s11 = smov 61  }
  0x74   :  { %394 = vrot.lane.b32.xlu0 %v946_v61, %s1202_s10  ;;  %v35_v2 = vpop.permute.xlu1 %34   ;;  %s1251_s10 = smov 22  }
  0x76   :  { %v12_v1 = vpop.permute.xlu0 %11   ;;  %414 = vrot.lane.b32.xlu1 %v949_v0, %s1205_s17  ;;  %s1214_s17 = smov 59   ;;  %v981_v0 = vld [vmem:[%s1686_s0 + $0xc] sm:$0x1]  }
  0x77   :  { %15 = vst.msk [vmem:[#allocation0 + $0x10] sm:$0x1] %vm13_vm1, %v12_v1   ;;  %vm116_vm1 = vcmask 950152  }
  0x78   :  { %18 = vst.msk [vmem:[#allocation0 + $0x8] sm:$0x1] %vm16_vm3, %v12_v1   ;;  %408 = vrot.lane.b32.xlu0 %v948_v63, %s1204_s16  ;;  %v42_v6 = vpop.permute.xlu1 %41   ;;  %vm130_vm3 = vcmask 933752   ;;  %v980_v63 = vld [vmem:[%s1686_s0 + $0x37] sm:$0x1]   ;;  %s1253_s16 = smov 20  }
  0x79   :  { %38 = vst.msk [vmem:[#allocation0 + $0x10] sm:$0x1] %vm36_vm4, %v35_v2   ;;  %vm136_vm4 = vcmask 925552  }
  0x7a   :  { %v26_v5 = vpop.permute.xlu0 %25   ;;  %428 = vrot.lane.b32.xlu1 %v951_v4, %s1207_s23  ;;  %s1216_s23 = smov 57   ;;  %v983_v4 = vld [vmem:[%s1686_s0 + $0x36] sm:$0x1]  }
  0x7b   :  { %29 = vst.msk [vmem:[#allocation0 + $0x8] sm:$0x1] %vm9_vm0, %v26_v5   ;;  %vm110_vm0 = vcmask 958352  }
  0x7c   :  { %31 = vst.msk [vmem:[#allocation0] sm:$0x1] %vm30_vm5, %v26_v5   ;;  %421 = vrot.lane.b32.xlu0 %v950_v3, %s1206_s22  ;;  %v55_v10 = vpop.permute.xlu1 %54   ;;  %vm143_vm5 = vcmask 917352   ;;  %v982_v3 = vld [vmem:[%s1686_s0 + $0x61] sm:$0x1]   ;;  %s1255_s22 = smov 18  }
  0x7d   :  { %45 = vst.msk [vmem:[#allocation0 + $0x8] sm:$0x1] %vm43_vm6, %v42_v6   ;;  %vm150_vm6 = vcmask 909152  }
  0x7e   :  { %v49_v9 = vpop.permute.xlu0 %48   ;;  %58 = vst.msk [vmem:[#allocation0 + $0x10] sm:$0x1] %vm56_vm8, %v55_v10   ;;  %441 = vrot.lane.b32.xlu1 %v953_v8, %s1209_s29  ;;  %s1218_s29 = smov 55   ;;  %vm163_vm8 = vcmask 892752   ;;  %v985_v8 = vld [vmem:[%s1686_s0 + $0x60] sm:$0x1]  }
  0x7f   :  { %51 = vst.msk [vmem:[#allocation0] sm:$0x1] %vm50_vm7, %v49_v9   ;;  %vm156_vm7 = vcmask 900952  }
  0x80   :  { %434 = vrot.lane.b32.xlu0 %v952_v7, %s1208_s28  ;;  %v69_v14 = vpop.permute.xlu1 %68   ;;  %v984_v7 = vld [vmem:[%s1686_s0 + $0xb] sm:$0x1]   ;;  %s1257_s28 = smov 16  }
  0x81   :  { %71 = vst.msk [vmem:[#allocation0] sm:$0x1] %vm70_vm10, %v69_v14   ;;  %vm176_vm10 = vcmask 876352  }
  0x82   :  { %v62_v13 = vpop.permute.xlu0 %61   ;;  %454 = vrot.lane.b32.xlu1 %v955_v12, %s1211_s6  ;;  %s1220_s6 = smov 53   ;;  %v987_v12 = vld [vmem:[%s1686_s0 + $0xa] sm:$0x1]  }
  0x83   :  { %65 = vst.msk [vmem:[#allocation0 + $0x8] sm:$0x1] %vm63_vm9, %v62_v13   ;;  %vm170_vm9 = vcmask 884552  }
  0x84   :  { %448 = vrot.lane.b32.xlu0 %v954_v11, %s1210_s5  ;;  %v82_v18 = vpop.permute.xlu1 %81   ;;  %v986_v11 = vld [vmem:[%s1686_s0 + $0x35] sm:$0x1]   ;;  %s1259_s5 = smov 14  }
  0x85   :  { %85 = vst.msk [vmem:[#allocation0 + $0x8] sm:$0x1] %vm83_vm12, %v82_v18   ;;  %vm190_vm12 = vcmask 859952  }
  0x86   :  { %v75_v17 = vpop.permute.xlu0 %74   ;;  %468 = vrot.lane.b32.xlu1 %v957_v16, %s1213_s12  ;;  %s1222_s12 = smov 51   ;;  %v989_v16 = vld [vmem:[%s1686_s0 + $0x34] sm:$0x1]  }
  0x87   :  { %78 = vst.msk [vmem:[#allocation0 + $0x10] sm:$0x1] %vm76_vm11, %v75_v17   ;;  %vm183_vm11 = vcmask 868152  }
  0x88   :  { %461 = vrot.lane.b32.xlu0 %v956_v15, %s1212_s11  ;;  %v95_v22 = vpop.permute.xlu1 %94   ;;  %v988_v15 = vld [vmem:[%s1686_s0 + $0x5f] sm:$0x1]   ;;  %s1261_s11 = smov 12  }
  0x89   :  { %98 = vst.msk [vmem:[#allocation0 + $0x10] sm:$0x1] %vm96_vm14, %v95_v22   ;;  %vm203_vm14 = vcmask 843552  }
  0x8a   :  { %v89_v21 = vpop.permute.xlu0 %88   ;;  %481 = vrot.lane.b32.xlu1 %v959_v20, %s1215_s18  ;;  %s1224_s18 = smov 49   ;;  %v991_v20 = vld [vmem:[%s1686_s0 + $0x5e] sm:$0x1]  }
  0x8b   :  { %91 = vst.msk [vmem:[#allocation0] sm:$0x1] %vm90_vm13, %v89_v21   ;;  %vm196_vm13 = vcmask 851752  }
  0x8c   :  { %474 = vrot.lane.b32.xlu0 %v958_v19, %s1214_s17  ;;  %v109_v26 = vpop.permute.xlu1 %108   ;;  %v990_v19 = vld [vmem:[%s1686_s0 + $0x9] sm:$0x1]   ;;  %s1263_s17 = smov 10  }
  0x8d   :  { %111 = vst.msk [vmem:[#allocation0] sm:$0x1] %vm110_vm0, %v109_v26   ;;  %vm216_vm0 = vcmask 827152  }
  0x8e   :  { %v102_v25 = vpop.permute.xlu0 %101   ;;  %494 = vrot.lane.b32.xlu1 %v961_v24, %s1217_s24  ;;  %s1226_s24 = smov 47   ;;  %v993_v24 = vld [vmem:[%s1686_s0 + $0x8] sm:$0x1]  }
  0x8f   :  { %105 = vst.msk [vmem:[#allocation0 + $0x8] sm:$0x1] %vm103_vm15, %v102_v25   ;;  %vm210_vm15 = vcmask 835352  }
  0x90   :  { %488 = vrot.lane.b32.xlu0 %v960_v23, %s1216_s23  ;;  %v122_v30 = vpop.permute.xlu1 %121   ;;  %v992_v23 = vld [vmem:[%s1686_s0 + $0x33] sm:$0x1]   ;;  %s1265_s23 = smov 8  }
  0x91   :  { %125 = vst.msk [vmem:[#allocation0 + $0x8] sm:$0x1] %vm123_vm2, %v122_v30   ;;  %vm230_vm2 = vcmask 810752  }
  0x92   :  { %v115_v29 = vpop.permute.xlu0 %114   ;;  %508 = vrot.lane.b32.xlu1 %v963_v28, %s1219_s30  ;;  %s1228_s30 = smov 45   ;;  %v995_v28 = vld [vmem:[%s1686_s0 + $0x32] sm:$0x1]  }
  0x93   :  { %118 = vst.msk [vmem:[#allocation0 + $0x10] sm:$0x1] %vm116_vm1, %v115_v29   ;;  %vm223_vm1 = vcmask 818952  }
  0x94   :  { %501 = vrot.lane.b32.xlu0 %v962_v27, %s1218_s29  ;;  %v135_v34 = vpop.permute.xlu1 %134   ;;  %v994_v27 = vld [vmem:[%s1686_s0 + $0x5d] sm:$0x1]   ;;  %s1267_s29 = smov 6  }
  0x95   :  { %138 = vst.msk [vmem:[#allocation0 + $0x10] sm:$0x1] %vm136_vm4, %v135_v34   ;;  %vm243_vm4 = vcmask 794352  }
  0x96   :  { %v129_v33 = vpop.permute.xlu0 %128   ;;  %521 = vrot.lane.b32.xlu1 %v965_v32, %s1221_s7  ;;  %s1230_s7 = smov 43   ;;  %v997_v32 = vld [vmem:[%s1686_s0 + $0x5c] sm:$0x1]  }
  0x97   :  { %131 = vst.msk [vmem:[#allocation0] sm:$0x1] %vm130_vm3, %v129_v33   ;;  %vm236_vm3 = vcmask 802552  }
  0x98   :  { %514 = vrot.lane.b32.xlu0 %v964_v31, %s1220_s6  ;;  %v149_v38 = vpop.permute.xlu1 %148   ;;  %v996_v31 = vld [vmem:[%s1686_s0 + $0x7] sm:$0x1]   ;;  %s1269_s6 = smov 4  }
  0x99   :  { %151 = vst.msk [vmem:[#allocation0] sm:$0x1] %vm150_vm6, %v149_v38   ;;  %vm256_vm6 = vcmask 777952  }
  0x9a   :  { %v142_v37 = vpop.permute.xlu0 %141   ;;  %534 = vrot.lane.b32.xlu1 %v967_v36, %s1223_s13  ;;  %s1232_s13 = smov 41   ;;  %v999_v36 = vld [vmem:[%s1686_s0 + $0x6] sm:$0x1]  }
  0x9b   :  { %145 = vst.msk [vmem:[#allocation0 + $0x8] sm:$0x1] %vm143_vm5, %v142_v37   ;;  %vm250_vm5 = vcmask 786152  }
  0x9c   :  { %528 = vrot.lane.b32.xlu0 %v966_v35, %s1222_s12  ;;  %v162_v42 = vpop.permute.xlu1 %161   ;;  %v998_v35 = vld [vmem:[%s1686_s0 + $0x31] sm:$0x1]   ;;  %s1271_s12 = smov 2  }
  0x9d   :  { %165 = vst.msk [vmem:[#allocation0 + $0x8] sm:$0x1] %vm163_vm8, %v162_v42   ;;  %vm270_vm8 = vcmask 761552  }
  0x9e   :  { %v155_v41 = vpop.permute.xlu0 %154   ;;  %548 = vrot.lane.b32.xlu1 %v969_v40, %s1225_s19  ;;  %s1234_s19 = smov 39   ;;  %v1001_v40 = vld [vmem:[%s1686_s0 + $0x30] sm:$0x1]  }
  0x9f   :  { %158 = vst.msk [vmem:[#allocation0 + $0x10] sm:$0x1] %vm156_vm7, %v155_v41   ;;  %vm263_vm7 = vcmask 769752  }
  0xa0   :  { %541 = vrot.lane.b32.xlu0 %v968_v39, %s1224_s18  ;;  %v175_v46 = vpop.permute.xlu1 %174   ;;  %v1000_v39 = vld [vmem:[%s1686_s0 + $0x5b] sm:$0x1]  }
  0xa1   :  { %178 = vst.msk [vmem:[#allocation0 + $0x10] sm:$0x1] %vm176_vm10, %v175_v46   ;;  %vm283_vm10 = vcmask 745152  }
  0xa2   :  { %v169_v45 = vpop.permute.xlu0 %168   ;;  %561 = vrot.lane.b32.xlu1 %v971_v44, %s1227_s25  ;;  %s1236_s25 = smov 37   ;;  %v1003_v44 = vld [vmem:[%s1686_s0 + $0x5a] sm:$0x1]  }
  0xa3   :  { %171 = vst.msk [vmem:[#allocation0] sm:$0x1] %vm170_vm9, %v169_v45   ;;  %vm276_vm9 = vcmask 753352  }
  0xa4   :  { %554 = vrot.lane.b32.xlu0 %v970_v43, %s1226_s24  ;;  %v189_v50 = vpop.permute.xlu1 %188   ;;  %v1002_v43 = vld [vmem:[%s1686_s0 + $0x5] sm:$0x1]  }
  0xa5   :  { %191 = vst.msk [vmem:[#allocation0] sm:$0x1] %vm190_vm12, %v189_v50   ;;  %vm296_vm12 = vcmask 728752  }
  0xa6   :  { %v182_v49 = vpop.permute.xlu0 %181   ;;  %574 = vrot.lane.b32.xlu1 %v973_v48, %s1229_s2  ;;  %s1238_s2 = smov 35   ;;  %v1005_v48 = vld [vmem:[%s1686_s0 + $0x4] sm:$0x1]  }
  0xa7   :  { %185 = vst.msk [vmem:[#allocation0 + $0x8] sm:$0x1] %vm183_vm11, %v182_v49   ;;  %vm290_vm11 = vcmask 736952  }
  0xa8   :  { %568 = vrot.lane.b32.xlu0 %v972_v47, %s1228_s30  ;;  %v202_v54 = vpop.permute.xlu1 %201   ;;  %v1004_v47 = vld [vmem:[%s1686_s0 + $0x2f] sm:$0x1]  }
  0xa9   :  { %205 = vst.msk [vmem:[#allocation0 + $0x8] sm:$0x1] %vm203_vm14, %v202_v54   ;;  %vm310_vm14 = vcmask 712352  }
  0xaa   :  { %v195_v53 = vpop.permute.xlu0 %194   ;;  %588 = vrot.lane.b32.xlu1 %v975_v52, %s1231_s8  ;;  %s1240_s8 = smov 33   ;;  %v1007_v52 = vld [vmem:[%s1686_s0 + $0x2e] sm:$0x1]  }
  0xab   :  { %198 = vst.msk [vmem:[#allocation0 + $0x10] sm:$0x1] %vm196_vm13, %v195_v53   ;;  %vm303_vm13 = vcmask 720552  }
  0xac   :  { %581 = vrot.lane.b32.xlu0 %v974_v51, %s1230_s7  ;;  %v215_v58 = vpop.permute.xlu1 %214   ;;  %v1006_v51 = vld [vmem:[%s1686_s0 + $0x59] sm:$0x1]  }
  0xad   :  { %218 = vst.msk [vmem:[#allocation0 + $0x10] sm:$0x1] %vm216_vm0, %v215_v58   ;;  %vm323_vm0 = vcmask 695952  }
  0xae   :  { %v209_v57 = vpop.permute.xlu0 %208   ;;  %601 = vrot.lane.b32.xlu1 %v977_v56, %s1233_s14  ;;  %s1242_s14 = smov 31   ;;  %v1009_v56 = vld [vmem:[%s1686_s0 + $0x58] sm:$0x1]  }
  0xaf   :  { %211 = vst.msk [vmem:[#allocation0] sm:$0x1] %vm210_vm15, %v209_v57   ;;  %vm316_vm15 = vcmask 704152  }
  0xb0   :  { %594 = vrot.lane.b32.xlu0 %v976_v55, %s1232_s13  ;;  %v229_v62 = vpop.permute.xlu1 %228   ;;  %v1008_v55 = vld [vmem:[%s1686_s0 + $0x3] sm:$0x1]  }
  0xb1   :  { %231 = vst.msk [vmem:[#allocation0] sm:$0x1] %vm230_vm2, %v229_v62   ;;  %vm336_vm2 = vcmask 679552  }
  0xb2   :  { %v222_v61 = vpop.permute.xlu0 %221   ;;  %614 = vrot.lane.b32.xlu1 %v979_v60, %s1235_s20  ;;  %s1244_s20 = smov 29   ;;  %v1011_v60 = vld [vmem:[%s1686_s0 + $0x2] sm:$0x1]  }
  0xb3   :  { %225 = vst.msk [vmem:[#allocation0 + $0x8] sm:$0x1] %vm223_vm1, %v222_v61   ;;  %vm330_vm1 = vcmask 687752  }
  0xb4   :  { %608 = vrot.lane.b32.xlu0 %v978_v59, %s1234_s19  ;;  %v242_v2 = vpop.permute.xlu1 %241   ;;  %v1010_v59 = vld [vmem:[%s1686_s0 + $0x2d] sm:$0x1]  }
  0xb5   :  { %245 = vst.msk [vmem:[#allocation0 + $0x8] sm:$0x1] %vm243_vm4, %v242_v2   ;;  %vm350_vm4 = vcmask 663152  }
  0xb6   :  { %v235_v1 = vpop.permute.xlu0 %234   ;;  %628 = vrot.lane.b32.xlu1 %v981_v0, %s1237_s26  ;;  %s1246_s26 = smov 27   ;;  %v1013_v0 = vld [vmem:[%s1686_s0 + $0x2c] sm:$0x1]  }
  0xb7   :  { %238 = vst.msk [vmem:[#allocation0 + $0x10] sm:$0x1] %vm236_vm3, %v235_v1   ;;  %vm343_vm3 = vcmask 671352  }
  0xb8   :  { %621 = vrot.lane.b32.xlu0 %v980_v63, %s1236_s25  ;;  %v255_v6 = vpop.permute.xlu1 %254   ;;  %v1012_v63 = vld [vmem:[%s1686_s0 + $0x57] sm:$0x1]  }
  0xb9   :  { %258 = vst.msk [vmem:[#allocation0 + $0x10] sm:$0x1] %vm256_vm6, %v255_v6   ;;  %vm363_vm6 = vcmask 646752  }
  0xba   :  { %v249_v5 = vpop.permute.xlu0 %248   ;;  %641 = vrot.lane.b32.xlu1 %v983_v4, %s1239_s3  ;;  %s1248_s3 = smov 25   ;;  %v1015_v4 = vld [vmem:[%s1686_s0 + $0x56] sm:$0x1]  }
  0xbb   :  { %251 = vst.msk [vmem:[#allocation0] sm:$0x1] %vm250_vm5, %v249_v5   ;;  %vm356_vm5 = vcmask 654952  }
  0xbc   :  { %634 = vrot.lane.b32.xlu0 %v982_v3, %s1238_s2  ;;  %v269_v10 = vpop.permute.xlu1 %268   ;;  %v1014_v3 = vld [vmem:[%s1686_s0 + $0x1] sm:$0x1]  }
  0xbd   :  { %271 = vst.msk [vmem:[#allocation0] sm:$0x1] %vm270_vm8, %v269_v10   ;;  %vm376_vm8 = vcmask 630352  }
  0xbe   :  { %v262_v9 = vpop.permute.xlu0 %261   ;;  %654 = vrot.lane.b32.xlu1 %v985_v8, %s1241_s9  ;;  %s1250_s9 = smov 23  }
  0xbf   :  { %265 = vst.msk [vmem:[#allocation0 + $0x8] sm:$0x1] %vm263_vm7, %v262_v9   ;;  %vm370_vm7 = vcmask 638552  }
  0xc0   :  { %648 = vrot.lane.b32.xlu0 %v984_v7, %s1240_s8  ;;  %v282_v14 = vpop.permute.xlu1 %281   ;;  %v1016_v7 = vld [vmem:[%s1686_s0 + $0x2b] sm:$0x1]   ;;  %s1272_s0 = smov 1  }
  0xc1   :  { %285 = vst.msk [vmem:[#allocation0 + $0x8] sm:$0x1] %vm283_vm10, %v282_v14   ;;  %vm390_vm10 = vcmask 613952  }
  0xc2   :  { %v275_v13 = vpop.permute.xlu0 %274   ;;  %668 = vrot.lane.b32.xlu1 %v987_v12, %s1243_s15  ;;  %s1252_s15 = smov 21  }
  0xc3   :  { %278 = vst.msk [vmem:[#allocation0 + $0x10] sm:$0x1] %vm276_vm9, %v275_v13   ;;  %vm383_vm9 = vcmask 622152  }
  0xc4   :  { %661 = vrot.lane.b32.xlu0 %v986_v11, %s1242_s14  ;;  %v295_v18 = vpop.permute.xlu1 %294  }
  0xc5   :  { %298 = vst.msk [vmem:[#allocation0 + $0x10] sm:$0x1] %vm296_vm12, %v295_v18   ;;  %vm403_vm12 = vcmask 597552  }
  0xc6   :  { %v289_v17 = vpop.permute.xlu0 %288   ;;  %681 = vrot.lane.b32.xlu1 %v989_v16, %s1245_s21  ;;  %s1254_s21 = smov 19  }
  0xc7   :  { %291 = vst.msk [vmem:[#allocation0] sm:$0x1] %vm290_vm11, %v289_v17   ;;  %vm396_vm11 = vcmask 605752  }
  0xc8   :  { %674 = vrot.lane.b32.xlu0 %v988_v15, %s1244_s20  ;;  %v309_v22 = vpop.permute.xlu1 %308  }
  0xc9   :  { %311 = vst.msk [vmem:[#allocation0] sm:$0x1] %vm310_vm14, %v309_v22   ;;  %vm416_vm14 = vcmask 581152  }
  0xca   :  { %v302_v21 = vpop.permute.xlu0 %301   ;;  %694 = vrot.lane.b32.xlu1 %v991_v20, %s1247_s27  ;;  %s1256_s27 = smov 17  }
  0xcb   :  { %305 = vst.msk [vmem:[#allocation0 + $0x8] sm:$0x1] %vm303_vm13, %v302_v21   ;;  %vm410_vm13 = vcmask 589352  }
  0xcc   :  { %688 = vrot.lane.b32.xlu0 %v990_v19, %s1246_s26  ;;  %v322_v26 = vpop.permute.xlu1 %321  }
  0xcd   :  { %325 = vst.msk [vmem:[#allocation0 + $0x8] sm:$0x1] %vm323_vm0, %v322_v26   ;;  %vm430_vm0 = vcmask 564752  }
  0xce   :  { %v315_v25 = vpop.permute.xlu0 %314   ;;  %708 = vrot.lane.b32.xlu1 %v993_v24, %s1249_s4  ;;  %s1258_s4 = smov 15  }
  0xcf   :  { %318 = vst.msk [vmem:[#allocation0 + $0x10] sm:$0x1] %vm316_vm15, %v315_v25   ;;  %vm423_vm15 = vcmask 572952  }
  0xd0   :  { %701 = vrot.lane.b32.xlu0 %v992_v23, %s1248_s3  ;;  %v335_v30 = vpop.permute.xlu1 %334  }
  0xd1   :  { %338 = vst.msk [vmem:[#allocation0 + $0x10] sm:$0x1] %vm336_vm2, %v335_v30   ;;  %vm443_vm2 = vcmask 548352  }
  0xd2   :  { %v329_v29 = vpop.permute.xlu0 %328   ;;  %721 = vrot.lane.b32.xlu1 %v995_v28, %s1251_s10  ;;  %s1260_s10 = smov 13  }
  0xd3   :  { %331 = vst.msk [vmem:[#allocation0] sm:$0x1] %vm330_vm1, %v329_v29   ;;  %vm436_vm1 = vcmask 556552  }
  0xd4   :  { %714 = vrot.lane.b32.xlu0 %v994_v27, %s1250_s9  ;;  %v349_v34 = vpop.permute.xlu1 %348  }
  0xd5   :  { %351 = vst.msk [vmem:[#allocation0] sm:$0x1] %vm350_vm4, %v349_v34   ;;  %vm456_vm4 = vcmask 531952  }
  0xd6   :  { %v342_v33 = vpop.permute.xlu0 %341   ;;  %734 = vrot.lane.b32.xlu1 %v997_v32, %s1253_s16  ;;  %s1262_s16 = smov 11  }
  0xd7   :  { %345 = vst.msk [vmem:[#allocation0 + $0x8] sm:$0x1] %vm343_vm3, %v342_v33   ;;  %vm450_vm3 = vcmask 540152  }
  0xd8   :  { %728 = vrot.lane.b32.xlu0 %v996_v31, %s1252_s15  ;;  %v362_v38 = vpop.permute.xlu1 %361  }
  0xd9   :  { %365 = vst.msk [vmem:[#allocation0 + $0x8] sm:$0x1] %vm363_vm6, %v362_v38   ;;  %vm470_vm6 = vcmask 515552  }
  0xda   :  { %v355_v37 = vpop.permute.xlu0 %354   ;;  %748 = vrot.lane.b32.xlu1 %v999_v36, %s1255_s22  ;;  %s1264_s22 = smov 9  }
  0xdb   :  { %358 = vst.msk [vmem:[#allocation0 + $0x10] sm:$0x1] %vm356_vm5, %v355_v37   ;;  %vm463_vm5 = vcmask 523752  }
  0xdc   :  { %741 = vrot.lane.b32.xlu0 %v998_v35, %s1254_s21  ;;  %v375_v42 = vpop.permute.xlu1 %374  }
  0xdd   :  { %378 = vst.msk [vmem:[#allocation0 + $0x10] sm:$0x1] %vm376_vm8, %v375_v42   ;;  %vm483_vm8 = vcmask 499152  }
  0xde   :  { %v369_v41 = vpop.permute.xlu0 %368   ;;  %761 = vrot.lane.b32.xlu1 %v1001_v40, %s1257_s28  ;;  %s1266_s28 = smov 7  }
  0xdf   :  { %371 = vst.msk [vmem:[#allocation0] sm:$0x1] %vm370_vm7, %v369_v41   ;;  %vm476_vm7 = vcmask 507352  }
  0xe0   :  { %754 = vrot.lane.b32.xlu0 %v1000_v39, %s1256_s27  ;;  %v389_v46 = vpop.permute.xlu1 %388  }
  0xe1   :  { %391 = vst.msk [vmem:[#allocation0] sm:$0x1] %vm390_vm10, %v389_v46   ;;  %vm496_vm10 = vcmask 482752  }
  0xe2   :  { %v382_v45 = vpop.permute.xlu0 %381   ;;  %774 = vrot.lane.b32.xlu1 %v1003_v44, %s1259_s5  ;;  %s1268_s5 = smov 5  }
  0xe3   :  { %385 = vst.msk [vmem:[#allocation0 + $0x8] sm:$0x1] %vm383_vm9, %v382_v45   ;;  %vm490_vm9 = vcmask 490952  }
  0xe4   :  { %768 = vrot.lane.b32.xlu0 %v1002_v43, %s1258_s4  ;;  %v402_v50 = vpop.permute.xlu1 %401  }
  0xe5   :  { %405 = vst.msk [vmem:[#allocation0 + $0x8] sm:$0x1] %vm403_vm12, %v402_v50   ;;  %vm510_vm12 = vcmask 466352  }
  0xe6   :  { %v395_v49 = vpop.permute.xlu0 %394   ;;  %788 = vrot.lane.b32.xlu1 %v1005_v48, %s1261_s11  ;;  %s1270_s11 = smov 3  }
  0xe7   :  { %398 = vst.msk [vmem:[#allocation0 + $0x10] sm:$0x1] %vm396_vm11, %v395_v49   ;;  %vm503_vm11 = vcmask 474552  }
  0xe8   :  { %781 = vrot.lane.b32.xlu0 %v1004_v47, %s1260_s10  ;;  %v415_v54 = vpop.permute.xlu1 %414  }
  0xe9   :  { %418 = vst.msk [vmem:[#allocation0 + $0x10] sm:$0x1] %vm416_vm14, %v415_v54   ;;  %vm523_vm14 = vcmask 449952  }
  0xea   :  { %v409_v53 = vpop.permute.xlu0 %408   ;;  %801 = vrot.lane.b32.xlu1 %v1007_v52, %s1263_s17 }
  0xeb   :  { %411 = vst.msk [vmem:[#allocation0] sm:$0x1] %vm410_vm13, %v409_v53   ;;  %vm516_vm13 = vcmask 458152  }
  0xec   :  { %794 = vrot.lane.b32.xlu0 %v1006_v51, %s1262_s16  ;;  %v429_v58 = vpop.permute.xlu1 %428  }
  0xed   :  { %431 = vst.msk [vmem:[#allocation0] sm:$0x1] %vm430_vm0, %v429_v58   ;;  %vm536_vm0 = vcmask 433552  }
  0xee   :  { %v422_v57 = vpop.permute.xlu0 %421   ;;  %814 = vrot.lane.b32.xlu1 %v1009_v56, %s1265_s23 }
  0xef   :  { %425 = vst.msk [vmem:[#allocation0 + $0x8] sm:$0x1] %vm423_vm15, %v422_v57   ;;  %vm530_vm15 = vcmask 441752  }
  0xf0   :  { %808 = vrot.lane.b32.xlu0 %v1008_v55, %s1264_s22  ;;  %v442_v62 = vpop.permute.xlu1 %441  }
  0xf1   :  { %445 = vst.msk [vmem:[#allocation0 + $0x8] sm:$0x1] %vm443_vm2, %v442_v62   ;;  %vm550_vm2 = vcmask 417152  }
  0xf2   :  { %v435_v61 = vpop.permute.xlu0 %434   ;;  %828 = vrot.lane.b32.xlu1 %v1011_v60, %s1267_s29 }
  0xf3   :  { %438 = vst.msk [vmem:[#allocation0 + $0x10] sm:$0x1] %vm436_vm1, %v435_v61   ;;  %vm543_vm1 = vcmask 425352  }
  0xf4   :  { %821 = vrot.lane.b32.xlu0 %v1010_v59, %s1266_s28  ;;  %v455_v2 = vpop.permute.xlu1 %454  }
  0xf5   :  { %458 = vst.msk [vmem:[#allocation0 + $0x10] sm:$0x1] %vm456_vm4, %v455_v2   ;;  %vm563_vm4 = vcmask 400752  }
  0xf6   :  { %v449_v1 = vpop.permute.xlu0 %448   ;;  %841 = vrot.lane.b32.xlu1 %v1013_v0, %s1269_s6 }
  0xf7   :  { %451 = vst.msk [vmem:[#allocation0] sm:$0x1] %vm450_vm3, %v449_v1   ;;  %vm556_vm3 = vcmask 408952  }
  0xf8   :  { %834 = vrot.lane.b32.xlu0 %v1012_v63, %s1268_s5  ;;  %v469_v6 = vpop.permute.xlu1 %468  }
  0xf9   :  { %471 = vst.msk [vmem:[#allocation0] sm:$0x1] %vm470_vm6, %v469_v6   ;;  %vm576_vm6 = vcmask 384352  }
  0xfa   :  { %v462_v5 = vpop.permute.xlu0 %461   ;;  %854 = vrot.lane.b32.xlu1 %v1015_v4, %s1271_s12 }
  0xfb   :  { %465 = vst.msk [vmem:[#allocation0 + $0x8] sm:$0x1] %vm463_vm5, %v462_v5   ;;  %vm570_vm5 = vcmask 392552  }
  0xfc   :  { %848 = vrot.lane.b32.xlu0 %v1014_v3, %s1270_s11  ;;  %v482_v9 = vpop.permute.xlu1 %481  }
  0xfd   :  { %485 = vst.msk [vmem:[#allocation0 + $0x8] sm:$0x1] %vm483_vm8, %v482_v9   ;;  %vm590_vm8 = vcmask 367952  }
  0xfe   :  { %v475_v8 = vpop.permute.xlu0 %474  }
  0xff   :  { %478 = vst.msk [vmem:[#allocation0 + $0x10] sm:$0x1] %vm476_vm7, %v475_v8   ;;  %vm583_vm7 = vcmask 376152  }
 0x100   :  { %861 = vrot.lane.b32.xlu0 %v1016_v7, %s1272_s0  ;;  %v495_v11 = vpop.permute.xlu1 %494  }
 0x101   :  { %498 = vst.msk [vmem:[#allocation0 + $0x10] sm:$0x1] %vm496_vm10, %v495_v11   ;;  %vm603_vm10 = vcmask 351552  }
 0x102   :  { %v489_v10 = vpop.permute.xlu0 %488  }
 0x103   :  { %491 = vst.msk [vmem:[#allocation0] sm:$0x1] %vm490_vm9, %v489_v10   ;;  %vm596_vm9 = vcmask 359752  }
 0x104   :  { %v509_v13 = vpop.permute.xlu1 %508  }
 0x105   :  { %511 = vst.msk [vmem:[#allocation0] sm:$0x1] %vm510_vm12, %v509_v13   ;;  %vm616_vm12 = vcmask 335152  }
 0x106   :  { %v502_v12 = vpop.permute.xlu0 %501  }
 0x107   :  { %505 = vst.msk [vmem:[#allocation0 + $0x8] sm:$0x1] %vm503_vm11, %v502_v12   ;;  %vm610_vm11 = vcmask 343352  }
 0x108   :  { %v522_v15 = vpop.permute.xlu1 %521  }
 0x109   :  { %525 = vst.msk [vmem:[#allocation0 + $0x8] sm:$0x1] %vm523_vm14, %v522_v15   ;;  %vm630_vm14 = vcmask 318752  }
 0x10a   :  { %v515_v14 = vpop.permute.xlu0 %514  }
 0x10b   :  { %518 = vst.msk [vmem:[#allocation0 + $0x10] sm:$0x1] %vm516_vm13, %v515_v14   ;;  %vm623_vm13 = vcmask 326952  }
 0x10c   :  { %v535_v17 = vpop.permute.xlu1 %534  }
 0x10d   :  { %538 = vst.msk [vmem:[#allocation0 + $0x10] sm:$0x1] %vm536_vm0, %v535_v17   ;;  %vm643_vm0 = vcmask 302352  }
 0x10e   :  { %v529_v16 = vpop.permute.xlu0 %528  }
 0x10f   :  { %531 = vst.msk [vmem:[#allocation0] sm:$0x1] %vm530_vm15, %v529_v16   ;;  %vm636_vm15 = vcmask 310552  }
 0x110   :  { %v549_v19 = vpop.permute.xlu1 %548  }
 0x111   :  { %551 = vst.msk [vmem:[#allocation0] sm:$0x1] %vm550_vm2, %v549_v19   ;;  %vm656_vm2 = vcmask 285952  }
 0x112   :  { %v542_v18 = vpop.permute.xlu0 %541  }
 0x113   :  { %545 = vst.msk [vmem:[#allocation0 + $0x8] sm:$0x1] %vm543_vm1, %v542_v18   ;;  %vm650_vm1 = vcmask 294152  }
 0x114   :  { %v562_v21 = vpop.permute.xlu1 %561  }
 0x115   :  { %565 = vst.msk [vmem:[#allocation0 + $0x8] sm:$0x1] %vm563_vm4, %v562_v21   ;;  %vm670_vm4 = vcmask 269552  }
 0x116   :  { %v555_v20 = vpop.permute.xlu0 %554  }
 0x117   :  { %558 = vst.msk [vmem:[#allocation0 + $0x10] sm:$0x1] %vm556_vm3, %v555_v20   ;;  %vm663_vm3 = vcmask 277752  }
 0x118   :  { %v575_v23 = vpop.permute.xlu1 %574  }
 0x119   :  { %578 = vst.msk [vmem:[#allocation0 + $0x10] sm:$0x1] %vm576_vm6, %v575_v23   ;;  %vm683_vm6 = vcmask 253152  }
 0x11a   :  { %v569_v22 = vpop.permute.xlu0 %568  }
 0x11b   :  { %571 = vst.msk [vmem:[#allocation0] sm:$0x1] %vm570_vm5, %v569_v22   ;;  %vm676_vm5 = vcmask 261352  }
 0x11c   :  { %v589_v25 = vpop.permute.xlu1 %588  }
 0x11d   :  { %591 = vst.msk [vmem:[#allocation0] sm:$0x1] %vm590_vm8, %v589_v25   ;;  %vm696_vm8 = vcmask 236752  }
 0x11e   :  { %v582_v24 = vpop.permute.xlu0 %581  }
 0x11f   :  { %585 = vst.msk [vmem:[#allocation0 + $0x8] sm:$0x1] %vm583_vm7, %v582_v24   ;;  %vm690_vm7 = vcmask 244952  }
 0x120   :  { %v602_v27 = vpop.permute.xlu1 %601  }
 0x121   :  { %605 = vst.msk [vmem:[#allocation0 + $0x8] sm:$0x1] %vm603_vm10, %v602_v27   ;;  %vm710_vm10 = vcmask 220352  }
 0x122   :  { %v595_v26 = vpop.permute.xlu0 %594  }
 0x123   :  { %598 = vst.msk [vmem:[#allocation0 + $0x10] sm:$0x1] %vm596_vm9, %v595_v26   ;;  %vm703_vm9 = vcmask 228552  }
 0x124   :  { %v615_v29 = vpop.permute.xlu1 %614  }
 0x125   :  { %618 = vst.msk [vmem:[#allocation0 + $0x10] sm:$0x1] %vm616_vm12, %v615_v29   ;;  %vm723_vm12 = vcmask 203952  }
 0x126   :  { %v609_v28 = vpop.permute.xlu0 %608  }
 0x127   :  { %611 = vst.msk [vmem:[#allocation0] sm:$0x1] %vm610_vm11, %v609_v28   ;;  %vm716_vm11 = vcmask 212152  }
 0x128   :  { %v629_v31 = vpop.permute.xlu1 %628  }
 0x129   :  { %631 = vst.msk [vmem:[#allocation0] sm:$0x1] %vm630_vm14, %v629_v31   ;;  %vm736_vm14 = vcmask 187552  }
 0x12a   :  { %v622_v30 = vpop.permute.xlu0 %621  }
 0x12b   :  { %625 = vst.msk [vmem:[#allocation0 + $0x8] sm:$0x1] %vm623_vm13, %v622_v30   ;;  %vm730_vm13 = vcmask 195752  }
 0x12c   :  { %v642_v33 = vpop.permute.xlu1 %641  }
 0x12d   :  { %645 = vst.msk [vmem:[#allocation0 + $0x8] sm:$0x1] %vm643_vm0, %v642_v33   ;;  %vm750_vm0 = vcmask 171152  }
 0x12e   :  { %v635_v32 = vpop.permute.xlu0 %634  }
 0x12f   :  { %638 = vst.msk [vmem:[#allocation0 + $0x10] sm:$0x1] %vm636_vm15, %v635_v32   ;;  %vm743_vm15 = vcmask 179352  }
 0x130   :  { %v655_v35 = vpop.permute.xlu1 %654  }
 0x131   :  { %658 = vst.msk [vmem:[#allocation0 + $0x10] sm:$0x1] %vm656_vm2, %v655_v35   ;;  %vm763_vm2 = vcmask 154752  }
 0x132   :  { %v649_v34 = vpop.permute.xlu0 %648  }
 0x133   :  { %651 = vst.msk [vmem:[#allocation0] sm:$0x1] %vm650_vm1, %v649_v34   ;;  %vm756_vm1 = vcmask 162952  }
 0x134   :  { %v669_v37 = vpop.permute.xlu1 %668  }
 0x135   :  { %671 = vst.msk [vmem:[#allocation0] sm:$0x1] %vm670_vm4, %v669_v37   ;;  %vm776_vm4 = vcmask 138352  }
 0x136   :  { %v662_v36 = vpop.permute.xlu0 %661  }
 0x137   :  { %665 = vst.msk [vmem:[#allocation0 + $0x8] sm:$0x1] %vm663_vm3, %v662_v36   ;;  %vm770_vm3 = vcmask 146552  }
 0x138   :  { %v682_v39 = vpop.permute.xlu1 %681  }
 0x139   :  { %685 = vst.msk [vmem:[#allocation0 + $0x8] sm:$0x1] %vm683_vm6, %v682_v39   ;;  %vm790_vm6 = vcmask 121952  }
 0x13a   :  { %v675_v38 = vpop.permute.xlu0 %674  }
 0x13b   :  { %678 = vst.msk [vmem:[#allocation0 + $0x10] sm:$0x1] %vm676_vm5, %v675_v38   ;;  %vm783_vm5 = vcmask 130152  }
 0x13c   :  { %v695_v41 = vpop.permute.xlu1 %694  }
 0x13d   :  { %698 = vst.msk [vmem:[#allocation0 + $0x10] sm:$0x1] %vm696_vm8, %v695_v41   ;;  %vm803_vm8 = vcmask 105552  }
 0x13e   :  { %v689_v40 = vpop.permute.xlu0 %688  }
 0x13f   :  { %691 = vst.msk [vmem:[#allocation0] sm:$0x1] %vm690_vm7, %v689_v40   ;;  %vm796_vm7 = vcmask 113752  }
 0x140   :  { %v709_v43 = vpop.permute.xlu1 %708  }
 0x141   :  { %711 = vst.msk [vmem:[#allocation0] sm:$0x1] %vm710_vm10, %v709_v43   ;;  %vm816_vm10 = vcmask 89152  }
 0x142   :  { %v702_v42 = vpop.permute.xlu0 %701  }
 0x143   :  { %705 = vst.msk [vmem:[#allocation0 + $0x8] sm:$0x1] %vm703_vm9, %v702_v42   ;;  %vm810_vm9 = vcmask 97352  }
 0x144   :  { %v722_v45 = vpop.permute.xlu1 %721  }
 0x145   :  { %725 = vst.msk [vmem:[#allocation0 + $0x8] sm:$0x1] %vm723_vm12, %v722_v45   ;;  %vm830_vm12 = vcmask 72752  }
 0x146   :  { %v715_v44 = vpop.permute.xlu0 %714  }
 0x147   :  { %718 = vst.msk [vmem:[#allocation0 + $0x10] sm:$0x1] %vm716_vm11, %v715_v44   ;;  %vm823_vm11 = vcmask 80952  }
 0x148   :  { %v735_v47 = vpop.permute.xlu1 %734  }
 0x149   :  { %738 = vst.msk [vmem:[#allocation0 + $0x10] sm:$0x1] %vm736_vm14, %v735_v47   ;;  %vm843_vm14 = vcmask 56352  }
 0x14a   :  { %v729_v46 = vpop.permute.xlu0 %728  }
 0x14b   :  { %731 = vst.msk [vmem:[#allocation0] sm:$0x1] %vm730_vm13, %v729_v46   ;;  %vm836_vm13 = vcmask 64552  }
 0x14c   :  { %v749_v49 = vpop.permute.xlu1 %748  }
 0x14d   :  { %751 = vst.msk [vmem:[#allocation0] sm:$0x1] %vm750_vm0, %v749_v49   ;;  %vm856_vm0 = vcmask 39952  }
 0x14e   :  { %v742_v48 = vpop.permute.xlu0 %741  }
 0x14f   :  { %745 = vst.msk [vmem:[#allocation0 + $0x8] sm:$0x1] %vm743_vm15, %v742_v48   ;;  %vm850_vm15 = vcmask 48152  }
 0x150   :  { %v762_v51 = vpop.permute.xlu1 %761  }
 0x151   :  { %765 = vst.msk [vmem:[#allocation0 + $0x8] sm:$0x1] %vm763_vm2, %v762_v51  }
 0x152   :  { %v755_v50 = vpop.permute.xlu0 %754  }
 0x153   :  { %758 = vst.msk [vmem:[#allocation0 + $0x10] sm:$0x1] %vm756_vm1, %v755_v50   ;;  %vm863_vm1 = vcmask 31752  }
 0x154   :  { %v775_v53 = vpop.permute.xlu1 %774  }
 0x155   :  { %778 = vst.msk [vmem:[#allocation0 + $0x10] sm:$0x1] %vm776_vm4, %v775_v53  }
 0x156   :  { %v769_v52 = vpop.permute.xlu0 %768  }
 0x157   :  { %771 = vst.msk [vmem:[#allocation0] sm:$0x1] %vm770_vm3, %v769_v52  }
 0x158   :  { %v789_v55 = vpop.permute.xlu1 %788  }
 0x159   :  { %791 = vst.msk [vmem:[#allocation0] sm:$0x1] %vm790_vm6, %v789_v55  }
 0x15a   :  { %v782_v54 = vpop.permute.xlu0 %781  }
 0x15b   :  { %785 = vst.msk [vmem:[#allocation0 + $0x8] sm:$0x1] %vm783_vm5, %v782_v54  }
 0x15c   :  { %v802_v57 = vpop.permute.xlu1 %801  }
 0x15d   :  { %805 = vst.msk [vmem:[#allocation0 + $0x8] sm:$0x1] %vm803_vm8, %v802_v57  }
 0x15e   :  { %v795_v56 = vpop.permute.xlu0 %794  }
 0x15f   :  { %798 = vst.msk [vmem:[#allocation0 + $0x10] sm:$0x1] %vm796_vm7, %v795_v56  }
 0x160   :  { %v815_v59 = vpop.permute.xlu1 %814  }
 0x161   :  { %818 = vst.msk [vmem:[#allocation0 + $0x10] sm:$0x1] %vm816_vm10, %v815_v59  }
 0x162   :  { %v809_v58 = vpop.permute.xlu0 %808  }
 0x163   :  { %811 = vst.msk [vmem:[#allocation0] sm:$0x1] %vm810_vm9, %v809_v58  }
 0x164   :  { %v829_v61 = vpop.permute.xlu1 %828  }
 0x165   :  { %831 = vst.msk [vmem:[#allocation0] sm:$0x1] %vm830_vm12, %v829_v61  }
 0x166   :  { %v822_v60 = vpop.permute.xlu0 %821  }
 0x167   :  { %825 = vst.msk [vmem:[#allocation0 + $0x8] sm:$0x1] %vm823_vm11, %v822_v60  }
 0x168   :  { %v842_v63 = vpop.permute.xlu1 %841  }
 0x169   :  { %845 = vst.msk [vmem:[#allocation0 + $0x8] sm:$0x1] %vm843_vm14, %v842_v63  }
 0x16a   :  { %v835_v62 = vpop.permute.xlu0 %834  }
 0x16b   :  { %838 = vst.msk [vmem:[#allocation0 + $0x10] sm:$0x1] %vm836_vm13, %v835_v62  }
 0x16c   :  { %v855_v1 = vpop.permute.xlu1 %854  }
 0x16d   :  { %858 = vst.msk [vmem:[#allocation0 + $0x10] sm:$0x1] %vm856_vm0, %v855_v1  }
 0x16e   :  { %v849_v0 = vpop.permute.xlu0 %848  }
 0x16f   :  { %851 = vst.msk [vmem:[#allocation0] sm:$0x1] %vm850_vm15, %v849_v0  }
 0x172   :  { %v862_v2 = vpop.permute.xlu0 %861  }
 0x173   :  { %865 = vst.msk [vmem:[#allocation0 + $0x8] sm:$0x1] %vm863_vm1, %v862_v2  }
 0x174   :  { %v881_v4 = vld [vmem:[#allocation0 + $0x10] sm:$0x1] }
 0x175   :  { %1018 = vst [vmem:[%s1687_s1 + $0x2] sm:$0x1] %v881_v4 }
 0x176   :  { %v870_v3 = vld [vmem:[#allocation0] sm:$0x1] }
 0x177   :  { %873 = vst [vmem:[%s1687_s1] sm:$0x1] %v870_v3 }
 0x17a   :  { %v875_v5 = vld [vmem:[#allocation0 + $0x8] sm:$0x1] }
 0x17b   :  { %1017 = vst [vmem:[%s1687_s1 + $0x1] sm:$0x1] %v875_v5 }

// kernel: sphere_sdf.1
= control target key start
LH: loop header
LB: loop body
LE: loop exit
PB: predicated region body
PF: predicated region fallthrough
CT: control target
= control target key end

     0   :  { %v648_v1 = vmov 0.0   ;;  %vm649_vm0 = vmmov 0   ;;  %v74_v16 = vlaneseq  ;;  %v650_v31 = vmov 1966171168   ;;  %s873_s0 = inlined_call_operand.<no memory space> [shape: f32[1], index: 0, kind: input, shape index: {}]   ;;  %s874_s1 = inlined_call_operand.vmem [shape: f32[1,384], index: 1, kind: input, shape index: {}]   ;;  %s875_s2 = inlined_call_operand.vmem [shape: bf16[384,128], index: 2, kind: input, shape index: {}]   ;;  %s876_s3 = inlined_call_operand.vmem [shape: f32[1,384], index: 3, kind: input, shape index: {}]   ;;  %s877_s4 = inlined_call_operand.hbm [shape: f32[1,128], index: 4, kind: output, shape index: {}]  }
   0x1   :  { %v680_v0 = vld [vmem:[%s875_s2 + $0x78] sm:$0xff]   ;;  %556 = vmatprep.subr.bf16.mxu1 %v648_v1  ;;  %572 = vmatprep.mubr.msk.bf16.mxu1 %vm649_vm0, %v648_v1  ;;  %v700_v4 = vld [vmem:[%s875_s2 + $0x70] sm:$0xff]   ;;  %v718_v7 = vld [vmem:[%s875_s2 + $0x68] sm:$0xff]   ;;  %v100_v32 = vunpack.c.l.s4 %v650_v31 }
   0x2   :  { %v686_v2 = vld [vmem:[%s875_s2 + $0x38] sm:$0xff]   ;;  %494 = vmatprep.subr.bf16.mxu0 %v680_v0  ;;  %v706_v5 = vld [vmem:[%s875_s2 + $0x30] sm:$0xff]   ;;  %v724_v8 = vld [vmem:[%s875_s2 + $0x28] sm:$0xff]   ;;  %v75_v20 = vshrl.u32 %v74_v16, 7 }
   0x3   :  { %v692_v3 = vld [vmem:[%s875_s2 + $0xb8] sm:$0xff]   ;;  %495 = vmatpush3.bf16.msra.mxu0 %v686_v2  ;;  %v713_v6 = vld [vmem:[%s875_s2 + $0xb0] sm:$0xff]   ;;  %v731_v9 = vld [vmem:[%s875_s2 + $0xa8] sm:$0xff]  }
   0x4   :  { %557 = vmatpush3.bf16.msra.mxu1 %v692_v3  ;;  %496 = vmatprep.subr.bf16.mxu0 %v700_v4  ;;  %v737_v10 = vld [vmem:[%s875_s2 + $0x60] sm:$0xff]   ;;  %v755_v13 = vld [vmem:[%s875_s2 + $0x58] sm:$0xff]   ;;  %v774_v17 = vld [vmem:[%s875_s2 + $0x50] sm:$0xff]   ;;  %v76_v25 = vsub.s32 0, %v75_v20  ;;  %v80_v29 = vsub.s32 1, %v75_v20  ;;  %v84_v30 = vsub.s32 2, %v75_v20 }
   0x5   :  { %558 = vmatprep.subr.bf16.mxu1 %v648_v1  ;;  %v742_v11 = vld [vmem:[%s875_s2 + $0x20] sm:$0xff]   ;;  %v761_v14 = vld [vmem:[%s875_s2 + $0x18] sm:$0xff]   ;;  %v780_v18 = vld [vmem:[%s875_s2 + $0x10] sm:$0xff]  }
   0x6   :  { %v748_v12 = vld [vmem:[%s875_s2 + $0xa0] sm:$0xff]   ;;  %v767_v15 = vld [vmem:[%s875_s2 + $0x98] sm:$0xff]   ;;  %v786_v19 = vld [vmem:[%s875_s2 + $0x90] sm:$0xff]  }
   0x7   :  { %497 = vmatpush3.bf16.msra.mxu0 %v706_v5  ;;  %v793_v21 = vld [vmem:[%s875_s2 + $0x48] sm:$0xff]   ;;  %v810_v24 = vld [vmem:[%s875_s2 + $0x40] sm:$0xff]  }
   0x8   :  { %559 = vmatpush3.bf16.msra.mxu1 %v713_v6  ;;  %498 = vmatprep.subr.bf16.mxu0 %v718_v7  ;;  %v799_v22 = vld [vmem:[%s875_s2 + $0x8] sm:$0xff]   ;;  %v20_v26 = vld [vmem:[%s874_s1] sm:$0x7] }
   0x9   :  { %560 = vmatprep.subr.bf16.mxu1 %v648_v1  ;;  %v804_v23 = vld [vmem:[%s875_s2 + $0x88] sm:$0xff]   ;;  %v70_v27 = vld [vmem:[%s876_s3] sm:$0x7] }
   0xa   :  { %v71_v28 = vsub.f32 %v70_v27, %v20_v26 }
   0xb   :  { %499 = vmatpush3.bf16.msra.mxu0 %v724_v8 }
   0xc   :  { %561 = vmatpush3.bf16.msra.mxu1 %v731_v9  ;;  %500 = vmatprep.subr.bf16.mxu0 %v737_v10 }
   0xd   :  { %562 = vmatprep.subr.bf16.mxu1 %v648_v1 }
   0xf   :  { %501 = vmatpush3.bf16.msra.mxu0 %v742_v11 }
  0x10   :  { %563 = vmatpush3.bf16.msra.mxu1 %v748_v12  ;;  %502 = vmatprep.subr.bf16.mxu0 %v755_v13 }
  0x11   :  { %564 = vmatprep.subr.bf16.mxu1 %v648_v1 }
  0x13   :  { %503 = vmatpush3.bf16.msra.mxu0 %v761_v14 }
  0x14   :  { %565 = vmatpush3.bf16.msra.mxu1 %v767_v15  ;;  %504 = vmatprep.subr.bf16.mxu0 %v774_v17 }
  0x15   :  { %566 = vmatprep.subr.bf16.mxu1 %v648_v1 }
  0x17   :  { %505 = vmatpush3.bf16.msra.mxu0 %v780_v18 }
  0x18   :  { %567 = vmatpush3.bf16.msra.mxu1 %v786_v19  ;;  %506 = vmatprep.subr.bf16.mxu0 %v793_v21 }
  0x19   :  { %568 = vmatprep.subr.bf16.mxu1 %v648_v1 }
  0x1a   :  { %10 = vsyncpa [#allocation4], 0  ;;  %v825_v33 = vld [vmem:[%s875_s2] sm:$0xff]   ;;  %v72_v34 = vmul.f32 %v71_v28, %v71_v28  ;;  %v101_v35 = vunpack.c.0.s8 %v100_v32  ;;  %s651_s14 = smov [#allocation3]  }
  0x1b   :  { %507 = vmatpush3.bf16.msra.mxu0 %v799_v22  ;;  %v623_v36 = vld [vmem:[%s875_s2 + $0x80] sm:$0xff]   ;;  %s462_s15 = sshll.u32 %s651_s14, 4  ;;  %s463_s15 = int_to_ptr.vmem [resolvable:$true] %s462_s15 }
  0x1c   :  { %569 = vmatpush3.bf16.msra.mxu1 %v804_v23  ;;  %508 = vmatprep.subr.bf16.mxu0 %v810_v24  ;;  %v77_v37 = vrot.slane %v72_v34, %v76_v25  ;;  %v81_v38 = vrot.slane %v72_v34, %v80_v29  ;;  %v85_v39 = vrot.slane %v72_v34, %v84_v30  ;;  %s626_s16 = scalar_lea.vmem %s463_s15, 16  ;;  %s630_s17 = scalar_lea.vmem %s463_s15, 32 }
  0x1d   :  { %570 = vmatprep.subr.bf16.mxu1 %v648_v1  ;;  %v104_v43 = vsub.s32 %v101_v35, %v75_v20  ;;  %p627_p0 = scmp.ne.s32.totalorder %s463_s15, %s626_s16  ;;  %p631_p1 = scmp.lt.s32.totalorder %s463_s15, %s463_s15 }
  0x1e   :  { %v89_v40 = vpack.c.bf16 %v77_v37, %v77_v37  ;;  %v90_v41 = vpack.c.bf16 %v81_v38, %v81_v38  ;;  %v91_v42 = vpack.c.bf16 %v85_v39, %v85_v39  ;;  %p632_p2 = scmp.lt.s32.totalorder %s630_s17, %s626_s16 }
  0x1f   :  { %509 = vmatpush3.bf16.msra.mxu0 %v825_v33 }
  0x20   :  { %571 = vmatpush3.bf16.msra.mxu1 %v623_v36  ;;  %525 = vmatprep.subr.bf16.mxu0 %v680_v0  ;;  %v92_v44 = vunpack.c.l.bf16 %v89_v40  ;;  %v93_v45 = vunpack.c.l.bf16 %v90_v41  ;;  %v94_v46 = vunpack.c.l.bf16 %v91_v42  ;;  %p633_p3 = por %p632_p2, %p631_p1 }
  0x21   :  { %576 = vmatprep.subr.bf16.mxu1 %v648_v1 }
  0x22   :  { %v98_v47 = vcombine.low %v92_v44, %v93_v45  ;;  %v112_v48 = vrot.slane %v94_v46, %v104_v43  ;;  %p634_p4 = pnand %p633_p3, %p627_p0 }
  0x24   :  { %v105_v49 = vrot.slane %v98_v47, %v104_v43 }
  0x26   :  { %v113_v50 = vcombine.low %v105_v49, %v112_v48 }
  0x28   :  { %v120_v51 = vrot.slane %v113_v50, %v104_v43 }
  0x2a   :  { %v122_v52 = vsub.f32 %v72_v34, %v120_v51 }
  0x2c   :  { %v131_v53 = vrot.slane %v122_v52, %v80_v29  ;;  %v127_v54 = vrot.slane %v122_v52, %v76_v25  ;;  %v135_v55 = vrot.slane %v122_v52, %v84_v30 }
  0x2e   :  { %v140_v56 = vpack.c.bf16 %v131_v53, %v131_v53  ;;  %v139_v57 = vpack.c.bf16 %v127_v54, %v127_v54  ;;  %v141_v58 = vpack.c.bf16 %v135_v55, %v135_v55 }
  0x30   :  { %318 = vmatprep.mubr.bf16.mxu0 %v140_v56  ;;  %573 = vmatmul.mubr.bf16.vlgmr.msra.gmra.mxu1 %v141_v58 }
  0x31   :  { %319 = vmatmul.mubr.bf16.vlgmr.msra.gmra.mxu0 %v139_v57  ;;  %577 = vmatpush3.bf16.msra.mxu1 %v692_v3 }
  0x32   :  { %526 = vmatpush3.bf16.msra.mxu0 %v686_v2  ;;  %578 = vmatprep.subr.bf16.mxu1 %v648_v1 }
  0x33   :  { %527 = vmatprep.subr.bf16.mxu0 %v700_v4  ;;  %398 = vmatprep.mubr.bf16.mxu0 %v90_v41 }
  0x34   :  { %592 = vmatprep.mubr.msk.bf16.mxu1 %vm649_vm0, %v648_v1 }
  0x35   :  { %579 = vmatpush3.bf16.msra.mxu1 %v713_v6 }
  0x36   :  { %528 = vmatpush3.bf16.msra.mxu0 %v706_v5  ;;  %580 = vmatprep.subr.bf16.mxu1 %v648_v1 }
  0x37   :  { %529 = vmatprep.subr.bf16.mxu0 %v718_v7 }
  0x39   :  { %581 = vmatpush3.bf16.msra.mxu1 %v731_v9 }
  0x3a   :  { %530 = vmatpush3.bf16.msra.mxu0 %v724_v8  ;;  %582 = vmatprep.subr.bf16.mxu1 %v648_v1 }
  0x3b   :  { %531 = vmatprep.subr.bf16.mxu0 %v737_v10 }
  0x3d   :  { %583 = vmatpush3.bf16.msra.mxu1 %v748_v12 }
  0x3e   :  { %532 = vmatpush3.bf16.msra.mxu0 %v742_v11  ;;  %584 = vmatprep.subr.bf16.mxu1 %v648_v1 }
  0x3f   :  { %533 = vmatprep.subr.bf16.mxu0 %v755_v13 }
  0x41   :  { %585 = vmatpush3.bf16.msra.mxu1 %v767_v15 }
  0x42   :  { %534 = vmatpush3.bf16.msra.mxu0 %v761_v14  ;;  %586 = vmatprep.subr.bf16.mxu1 %v648_v1 }
  0x43   :  { %535 = vmatprep.subr.bf16.mxu0 %v774_v17 }
  0x45   :  { %587 = vmatpush3.bf16.msra.mxu1 %v786_v19  ;;  %v453_v19 = vstv %s873_s0 }
  0x46   :  { %536 = vmatpush3.bf16.msra.mxu0 %v780_v18  ;;  %588 = vmatprep.subr.bf16.mxu1 %v648_v1 }
  0x47   :  { %537 = vmatprep.subr.bf16.mxu0 %v793_v21 }
  0x49   :  { %589 = vmatpush3.bf16.msra.mxu1 %v804_v23 }
  0x4a   :  { %538 = vmatpush3.bf16.msra.mxu0 %v799_v22  ;;  %590 = vmatprep.subr.bf16.mxu1 %v648_v1 }
  0x4b   :  { %539 = vmatprep.subr.bf16.mxu0 %v810_v24 }
  0x4d   :  { %591 = vmatpush3.bf16.msra.mxu1 %v623_v36 }
  0x4e   :  { %540 = vmatpush3.bf16.msra.mxu0 %v825_v33 }
  0x50   :  { %593 = vmatmul.mubr.bf16.vlgmr.msra.gmra.mxu1 %v91_v42 }
  0x51   :  { %399 = vmatmul.mubr.bf16.vlgmr.msra.gmra.mxu0 %v89_v40 }
  0xf0   :  { %v360_v59 = vpop.f32.mrf.mxu1 }
  0xf1   :  { %v510_v60 = vpop.f32.mrf.mxu0 }
  0xf2   :  { %v574_v61 = vpop.f32.mrf.mxu1 }
  0xf3   :  { %v511_v62 = vpop.f32.mrf.mxu0 }
  0xf4   :  { %v363_v63 = vpop.f32.mrf.mxu1  ;;  %v512_v4 = vadd.f32 %v511_v62, %v510_v60 }
  0xf5   :  { %v513_v0 = vpop.f32.mrf.mxu0 }
  0xf6   :  { %v575_v2 = vpop.f32.mrf.mxu1  ;;  %v361_v8 = vadd.f32 %v512_v4, %v360_v59 }
  0xf7   :  { %v514_v3 = vpop.f32.mrf.mxu0 }
 0x110   :  { %v440_v5 = vpop.f32.mrf.mxu1 }
 0x111   :  { %v541_v6 = vpop.f32.mrf.mxu0 }
 0x112   :  { %v594_v7 = vpop.f32.mrf.mxu1 }
 0x113   :  { %v542_v1 = vpop.f32.mrf.mxu0 }
 0x114   :  { %v543_v9 = vadd.f32 %v542_v1, %v541_v6  ;;  %v443_v10 = vpop.f32.mrf.mxu1 }
 0x115   :  { %v544_v11 = vpop.f32.mrf.mxu0 }
 0x116   :  { %v401_v12 = vadd.f32 %v543_v9, %v361_v8  ;;  %v595_v13 = vpop.f32.mrf.mxu1 }
 0x117   :  { %v545_v14 = vpop.f32.mrf.mxu0 }
 0x118   :  { %v441_v15 = vadd.f32 %v440_v5, %v401_v12 }
 0x11a   :  { %624 = vrsqrt.f32 %v441_v15  ;;  %vm448_vm1 = vcmp.eq.f32.partialorder %v441_v15, inf  ;;  %v451_v18 = vand.u32 2147483648, %v441_v15  ;;  %vm450_vm2 = vcmp.eq.f32.partialorder %v441_v15, 0.0 }
 0x127   :  { %v625_v16 = vpop.eup %624 }
 0x128   :  { %v447_v17 = vmul.f32 %v625_v16, %v441_v15 }
 0x12a   :  { %v449_v20 = vsel %vm448_vm1, %v441_v15, %v447_v17 }
 0x12b   :  { %v452_v21 = vsel %vm450_vm2, %v451_v18, %v449_v20 }
 0x12c   :  { %v454_v22 = vsub.f32 %v452_v21, %v453_v19 }
 0x12e   :  { %455 = vst [vmem:[#allocation3] sm:$0x1] %v454_v22 }
 0x12f   :  { %637 = shalt.err (!%p634_p4)
}
 0x130   :  { %465 = dma.vmem_to_hbm [thread:$0]  %s463_s15, 16, %s877_s4, [#allocation4]  }
 0x131   :  { %646 = dma.done.wait [#allocation4], 16  }
 0x132   :  { %647 = vsyncadd [#allocation4], 4294967280 }
 0x133   :  { %469 = vsyncpa [#allocation4], 1 }

</bundles_post_ra>
